<compile_context>
chip_gen: v7x
topology: tpu7x:2x2x1
jax: 0.10.0
libtpu: 0.0.40
codegen_flags: <defaults>
</compile_context>

<pallas_src>
import functools

import jax
import jax.numpy as jnp
from jax.experimental import pallas as pl
from jax.experimental.pallas import tpu as pltpu


def _round_up(v, m):
    return ((v + m - 1) // m) * m


def _vmem_config():
    """(pipeline byte budget, vmem_limit_bytes) tuned per TPU generation."""
    cap = None
    try:
        cap = getattr(pltpu.get_tpu_info(), "vmem_capacity_bytes", None)
    except Exception:
        cap = None
    if cap is None:
        cap = 64 * 1024 * 1024                       # conservative: v7x-class
    if cap >= 128 * 1024 * 1024:                     # v5e / v6e (128 MiB VMEM)
        return 64 * 1024 * 1024, 100 * 1024 * 1024
    return 40 * 1024 * 1024, 48 * 1024 * 1024        # v7x (64 MiB physical)


def _attention_scale(pool_x, pool_g, wxT_ref, bx_ref, wgT_ref, bg_ref):
    """sigmoid(pool_x @ Wx.T + bx + pool_g @ Wg.T + bg), f32."""
    att = (jnp.dot(pool_x, wxT_ref[...], preferred_element_type=jnp.float32)
           + bx_ref[...]
           + jnp.dot(pool_g, wgT_ref[...], preferred_element_type=jnp.float32)
           + bg_ref[...])
    return jax.nn.sigmoid(att)


# --------------------------- fused single-kernel path ------------------------

def _ca_kernel_wide(x_ref, g_ref, wxT_ref, bx_ref, wgT_ref, bg_ref,
                    ox_ref, og_ref, *, inv_hw):
    # Blocks: (TB, C, HW) with HW the full (unpadded) spatial extent.
    x = x_ref[...]
    g = g_ref[...]
    pool_x = jnp.sum(x, axis=-1, dtype=jnp.float32) * inv_hw        # (TB, C)
    pool_g = jnp.sum(g, axis=-1, dtype=jnp.float32) * inv_hw        # (TB, C)
    scale = _attention_scale(pool_x, pool_g, wxT_ref, bx_ref, wgT_ref, bg_ref)
    s = scale[:, :, None].astype(x.dtype)                           # (TB, C, 1)
    ox_ref[...] = jnp.maximum(x * s, 0).astype(ox_ref.dtype)
    og_ref[...] = jnp.maximum(g * s, 0).astype(og_ref.dtype)


def _ca_kernel_folded(x_ref, g_ref, wxT_ref, bx_ref, wgT_ref, bg_ref,
                      fold_ref, unfold_ref, ox_ref, og_ref, *, inv_hw):
    # Blocks: (TB, C*S, 128); channel c owns folded rows [c*S, (c+1)*S).
    # fold (C*S, C) / unfold (C, C*S) are precomputed 0/1 matrices (wrapper).
    x = x_ref[...]
    g = g_ref[...]
    row_x = jnp.sum(x, axis=-1, dtype=jnp.float32)                  # (TB, C*S)
    row_g = jnp.sum(g, axis=-1, dtype=jnp.float32)                  # (TB, C*S)
    pool_x = jnp.dot(row_x, fold_ref[...],
                     preferred_element_type=jnp.float32) * inv_hw   # (TB, C)
    pool_g = jnp.dot(row_g, fold_ref[...],
                     preferred_element_type=jnp.float32) * inv_hw   # (TB, C)
    scale = _attention_scale(pool_x, pool_g, wxT_ref, bx_ref, wgT_ref, bg_ref)
    s = jnp.dot(scale, unfold_ref[...],
                preferred_element_type=jnp.float32)                 # (TB, C*S)
    s = s[:, :, None].astype(x.dtype)
    ox_ref[...] = jnp.maximum(x * s, 0).astype(ox_ref.dtype)
    og_ref[...] = jnp.maximum(g * s, 0).astype(og_ref.dtype)


# ------------------------ split path for huge C*HW slabs ---------------------

def _pool_scale_kernel(x_ref, g_ref, wxT_ref, bx_ref, wgT_ref, bg_ref,
                       scale_ref, sx_ref, sg_ref, *, hw, thw, inv_hw):
    # grid = (B, n_hw); hw axis is the reduction ("arbitrary", innermost).
    h = pl.program_id(1)

    @pl.when(h == 0)
    def _():
        sx_ref[...] = jnp.zeros_like(sx_ref)
        sg_ref[...] = jnp.zeros_like(sg_ref)

    x = x_ref[...]                                   # (1, C, THW)
    g = g_ref[...]
    lane = jax.lax.broadcasted_iota(jnp.int32, x.shape, 2)
    valid = lane < (hw - h * thw)                    # mask the HW tail block
    zx = jnp.zeros((), x.dtype)
    zg = jnp.zeros((), g.dtype)
    sx_ref[...] += jnp.sum(jnp.where(valid, x, zx), axis=-1, dtype=jnp.float32)
    sg_ref[...] += jnp.sum(jnp.where(valid, g, zg), axis=-1, dtype=jnp.float32)

    @pl.when(h == pl.num_programs(1) - 1)
    def _():
        scale = _attention_scale(sx_ref[...] * inv_hw, sg_ref[...] * inv_hw,
                                 wxT_ref, bx_ref, wgT_ref, bg_ref)
        scale_ref[...] = scale[:, :, None]           # (1, C, 1), f32


def _apply_scale_kernel(x_ref, g_ref, scale_ref, ox_ref, og_ref):
    s = scale_ref[...].astype(x_ref.dtype)           # (1, C, 1)
    ox_ref[...] = jnp.maximum(x_ref[...] * s, 0).astype(ox_ref.dtype)
    og_ref[...] = jnp.maximum(g_ref[...] * s, 0).astype(og_ref.dtype)


# ----------------------------------- wrapper ---------------------------------

def ca_forward(x, g, wx, bx, wg, bg, *, vmem_block_budget=None):
    """x, g: (B, C, H, W) with identical shapes (required by the original
    module for the `g * scale` broadcast). wx: (C, C), wg: (C, C), bx/bg: (C,)."""
    B, C, H, W = x.shape
    assert g.shape == x.shape, "CA requires g to match x for scale broadcasting"
    HW = H * W
    inv_hw = 1.0 / HW
    dtype = x.dtype
    itemsize = jnp.dtype(dtype).itemsize
    packing = max(1, 4 // itemsize)                  # sublane packing factor

    budget, vmem_limit = _vmem_config()
    if vmem_block_budget is not None:
        budget = int(vmem_block_budget)

    # Contiguous reshapes only: no extra HBM pass, no pad, no post-slice.
    x_flat = x.reshape(B, C, HW)
    g_flat = g.reshape(B, C, HW)

    wxT = wx.T                                       # (C, C)
    wgT = wg.T                                       # (C, C)
    bx2 = bx.reshape(1, C)
    bg2 = bg.reshape(1, C)

    # Sublane-dense fold only when it is free (HW already lane-aligned) and the
    # channel count underfills a vreg for this dtype.
    use_fold = (C < 8 * packing) and (HW % 128 == 0) and (HW >= 128)
    if use_fold:
        S = HW // 128
        rows, lanes = C * S, 128
        x_in = x_flat.reshape(B, rows, lanes)        # contiguous: free
        g_in = g_flat.reshape(B, rows, lanes)
        r = jnp.arange(C * S, dtype=jnp.int32)[:, None] // S
        c = jnp.arange(C, dtype=jnp.int32)[None, :]
        fold = (r == c).astype(jnp.float32)          # (C*S, C)
        unfold = fold.T                              # (C, C*S)
    else:
        S = 0
        rows, lanes = C, HW
        x_in, g_in = x_flat, g_flat
        fold = unfold = None

    # ----- VMEM budgeting (on-chip padded sizes; weights deducted) -----------
    rows_pad = _round_up(rows, 8 * packing)
    lanes_pad = _round_up(lanes, 128)
    bytes_per_batch = rows_pad * lanes_pad * itemsize
    const_bytes = 2 * (C * C + C) * jnp.dtype(wx.dtype).itemsize
    if use_fold:
        const_bytes += 2 * C * S * C * 4
    avail = max(budget - 2 * const_bytes, budget // 2)

    if 8 * bytes_per_batch <= avail:
        # ------------------- fused single-kernel path ------------------------
        TB = max(1, min(B, avail // (8 * bytes_per_batch)))
        if B >= 2:
            TB = min(TB, -(-B // 2))                 # grid >= 2 (v7x dual-TC)
        for d in range(TB, 0, -1):                   # prefer TB | B
            if B % d == 0:
                if 2 * d >= TB:
                    TB = d
                break
        grid = (pl.cdiv(B, TB),)
        block = (TB, rows, lanes)

        in_specs = [
            pl.BlockSpec(block, lambda b: (b, 0, 0)),        # x
            pl.BlockSpec(block, lambda b: (b, 0, 0)),        # g
            pl.BlockSpec((C, C), lambda b: (0, 0)),          # Wx.T
            pl.BlockSpec((1, C), lambda b: (0, 0)),          # bx
            pl.BlockSpec((C, C), lambda b: (0, 0)),          # Wg.T
            pl.BlockSpec((1, C), lambda b: (0, 0)),          # bg
        ]
        args = [x_in, g_in, wxT, bx2, wgT, bg2]
        if use_fold:
            kernel = functools.partial(_ca_kernel_folded, inv_hw=inv_hw)
            in_specs += [
                pl.BlockSpec((C * S, C), lambda b: (0, 0)),  # fold
                pl.BlockSpec((C, C * S), lambda b: (0, 0)),  # unfold
            ]
            args += [fold, unfold]
        else:
            kernel = functools.partial(_ca_kernel_wide, inv_hw=inv_hw)

        out_x, out_g = pl.pallas_call(
            kernel,
            out_shape=(
                jax.ShapeDtypeStruct((B, rows, lanes), dtype),
                jax.ShapeDtypeStruct((B, rows, lanes), g.dtype),
            ),
            grid_spec=pltpu.PrefetchScalarGridSpec(
                num_scalar_prefetch=0,
                grid=grid,
                in_specs=in_specs,
                out_specs=[pl.BlockSpec(block, lambda b: (b, 0, 0)),
                           pl.BlockSpec(block, lambda b: (b, 0, 0))],
            ),
            compiler_params=pltpu.CompilerParams(
                dimension_semantics=("parallel",),
                vmem_limit_bytes=vmem_limit,
            ),
        )(*args)
        return out_x.reshape(B, C, H, W), out_g.reshape(B, C, H, W)

    # ---------------- two-kernel split path for large C*HW slabs -------------
    thw = max(128, (avail // (8 * C * itemsize)) // 128 * 128)
    thw = min(thw, _round_up(HW, 128))
    n_hw = pl.cdiv(HW, thw)
    # TODO(synk): if C alone is so large that even a 128-lane tile overshoots
    # the budget, additionally tile the channel axis in both kernels.

    scale = pl.pallas_call(
        functools.partial(_pool_scale_kernel, hw=HW, thw=thw, inv_hw=inv_hw),
        out_shape=jax.ShapeDtypeStruct((B, C, 1), jnp.float32),
        grid_spec=pltpu.PrefetchScalarGridSpec(
            num_scalar_prefetch=0,
            grid=(B, n_hw),
            in_specs=[
                pl.BlockSpec((1, C, thw), lambda b, h: (b, 0, h)),
                pl.BlockSpec((1, C, thw), lambda b, h: (b, 0, h)),
                pl.BlockSpec((C, C), lambda b, h: (0, 0)),
                pl.BlockSpec((1, C), lambda b, h: (0, 0)),
                pl.BlockSpec((C, C), lambda b, h: (0, 0)),
                pl.BlockSpec((1, C), lambda b, h: (0, 0)),
            ],
            out_specs=pl.BlockSpec((1, C, 1), lambda b, h: (b, 0, 0)),
            scratch_shapes=[pltpu.VMEM((1, C), jnp.float32),
                            pltpu.VMEM((1, C), jnp.float32)],
        ),
        compiler_params=pltpu.CompilerParams(
            dimension_semantics=("parallel", "arbitrary"),
            vmem_limit_bytes=vmem_limit,
        ),
    )(x_flat, g_flat, wxT, bx2, wgT, bg2)

    out_x, out_g = pl.pallas_call(
        _apply_scale_kernel,
        out_shape=(
            jax.ShapeDtypeStruct((B, C, HW), dtype),
            jax.ShapeDtypeStruct((B, C, HW), g.dtype),
        ),
        grid_spec=pltpu.PrefetchScalarGridSpec(
            num_scalar_prefetch=0,
            grid=(B, n_hw),
            in_specs=[
                pl.BlockSpec((1, C, thw), lambda b, h: (b, 0, h)),
                pl.BlockSpec((1, C, thw), lambda b, h: (b, 0, h)),
                pl.BlockSpec((1, C, 1), lambda b, h: (b, 0, 0)),
            ],
            out_specs=[pl.BlockSpec((1, C, thw), lambda b, h: (b, 0, h)),
                       pl.BlockSpec((1, C, thw), lambda b, h: (b, 0, h))],
        ),
        compiler_params=pltpu.CompilerParams(
            dimension_semantics=("parallel", "parallel"),
            vmem_limit_bytes=vmem_limit,
        ),
    )(x_flat, g_flat, scale)

    return out_x.reshape(B, C, H, W), out_g.reshape(B, C, H, W)


# --------------------------------- reference ---------------------------------

def _reference(x, g, wx, bx, wg, bg):
    pool_x = jnp.mean(x, axis=(2, 3))
    pool_g = jnp.mean(g, axis=(2, 3))
    att_x = pool_x @ wx.T + bx
    att_g = pool_g @ wg.T + bg
    scale = jax.nn.sigmoid(att_x + att_g)[:, :, None, None]
    return jnp.maximum(x * scale, 0.0), jnp.maximum(g * scale, 0.0)


def _make_inputs(key, B, C, H, W):
    kx, kg, kwx, kbx, kwg, kbg = jax.random.split(key, 6)
    x = jax.random.normal(kx, (B, C, H, W), dtype=jnp.float32)
    g = jax.random.normal(kg, (B, C, H, W), dtype=jnp.float32)
    bound = 1.0 / (C ** 0.5)
    wx = jax.random.uniform(kwx, (C, C), jnp.float32, -bound, bound)
    bx = jax.random.uniform(kbx, (C,), jnp.float32, -bound, bound)
    wg = jax.random.uniform(kwg, (C, C), jnp.float32, -bound, bound)
    bg = jax.random.uniform(kbg, (C,), jnp.float32, -bound, bound)
    return x, g, wx, bx, wg, bg


if __name__ == "__main__":
    key = jax.random.PRNGKey(0)
    k1, k2, k3 = jax.random.split(key, 3)

    # 1) Small folded path (F_g == F_x == C, HW % 128 == 0, C < 8).
    x, g, wx, bx, wg, bg = _make_inputs(k1, 2, 4, 16, 16)
    out_x, out_g = jax.jit(ca_forward)(x, g, wx, bx, wg, bg)
    jax.block_until_ready((out_x, out_g))
    ref_x, ref_g = _reference(x, g, wx, bx, wg, bg)
    assert jnp.allclose(out_x, ref_x, atol=1e-5, rtol=1e-5)
    assert jnp.allclose(out_g, ref_g, atol=1e-5, rtol=1e-5)

    # 2) Force the split (pool + apply) path with a tiny VMEM budget.
    x, g, wx, bx, wg, bg = _make_inputs(k2, 2, 8, 32, 32)
    out_x, out_g = jax.jit(
        functools.partial(ca_forward, vmem_block_budget=64 * 1024)
    )(x, g, wx, bx, wg, bg)
    jax.block_until_ready((out_x, out_g))
    ref_x, ref_g = _reference(x, g, wx, bx, wg, bg)
    assert jnp.allclose(out_x, ref_x, atol=1e-5, rtol=1e-5)
    assert jnp.allclose(out_g, ref_g, atol=1e-5, rtol=1e-5)

    # 3) Wide path with HW not a multiple of 128 (no pad / no slice).
    x, g, wx, bx, wg, bg = _make_inputs(k3, 3, 8, 15, 15)
    out_x, out_g = jax.jit(ca_forward)(x, g, wx, bx, wg, bg)
    jax.block_until_ready((out_x, out_g))
    ref_x, ref_g = _reference(x, g, wx, bx, wg, bg)
    assert jnp.allclose(out_x, ref_x, atol=1e-5, rtol=1e-5)
    assert jnp.allclose(out_g, ref_g, atol=1e-5, rtol=1e-5)

    print("KERNEL_OK")
</pallas_src>

<mosaic_0001>
module attributes {stable_mosaic.version = 11 : i64} {
  func.func @_ca_kernel_folded(%arg0: i32, %arg1: memref<1x8x128xf32, #tpu.memory_space<vmem>>, %arg2: memref<1x8x128xf32, #tpu.memory_space<vmem>>, %arg3: memref<4x4xf32, #tpu.memory_space<vmem>>, %arg4: memref<1x4xf32, #tpu.memory_space<vmem>>, %arg5: memref<4x4xf32, #tpu.memory_space<vmem>>, %arg6: memref<1x4xf32, #tpu.memory_space<vmem>>, %arg7: memref<8x4xf32, #tpu.memory_space<vmem>>, %arg8: memref<4x8xf32, #tpu.memory_space<vmem>>, %arg9: memref<1x8x128xf32, #tpu.memory_space<vmem>>, %arg10: memref<1x8x128xf32, #tpu.memory_space<vmem>>) attributes {dimension_semantics = [#tpu.dimension_semantics<parallel>], iteration_bounds = array<i64: 2>, scalar_prefetch = 0 : i64, scratch_operands = 0 : i64, tpu.core_type = #tpu.core_type<tc>, window_params = [{transform_indices = @transform_0, window_bounds = array<i64: 1, 8, 128>}, {transform_indices = @transform_1, window_bounds = array<i64: 1, 8, 128>}, {pipeline_mode = #tpu.pipeline_mode<synchronous>, transform_indices = @transform_2, window_bounds = array<i64: 4, 4>}, {pipeline_mode = #tpu.pipeline_mode<synchronous>, transform_indices = @transform_3, window_bounds = array<i64: 1, 4>}, {pipeline_mode = #tpu.pipeline_mode<synchronous>, transform_indices = @transform_4, window_bounds = array<i64: 4, 4>}, {pipeline_mode = #tpu.pipeline_mode<synchronous>, transform_indices = @transform_5, window_bounds = array<i64: 1, 4>}, {pipeline_mode = #tpu.pipeline_mode<synchronous>, transform_indices = @transform_6, window_bounds = array<i64: 8, 4>}, {pipeline_mode = #tpu.pipeline_mode<synchronous>, transform_indices = @transform_7, window_bounds = array<i64: 4, 8>}, {transform_indices = @transform_8, window_bounds = array<i64: 1, 8, 128>}, {transform_indices = @transform_9, window_bounds = array<i64: 1, 8, 128>}]} {
    %c0 = arith.constant 0 : index
    %c0_0 = arith.constant 0 : index
    %c0_1 = arith.constant 0 : index
    %0 = vector.load %arg1[%c0, %c0_0, %c0_1] : memref<1x8x128xf32, #tpu.memory_space<vmem>>, vector<1x8x128xf32>
    %c0_2 = arith.constant 0 : index
    %c0_3 = arith.constant 0 : index
    %c0_4 = arith.constant 0 : index
    %1 = vector.load %arg2[%c0_2, %c0_3, %c0_4] : memref<1x8x128xf32, #tpu.memory_space<vmem>>, vector<1x8x128xf32>
    %cst = arith.constant dense<0.000000e+00> : vector<1x8xf32>
    %2 = vector.multi_reduction <add>, %0, %cst [2] : vector<1x8x128xf32> to vector<1x8xf32>
    %cst_5 = arith.constant dense<0.000000e+00> : vector<1x8xf32>
    %3 = vector.multi_reduction <add>, %1, %cst_5 [2] : vector<1x8x128xf32> to vector<1x8xf32>
    %c0_6 = arith.constant 0 : index
    %c0_7 = arith.constant 0 : index
    %4 = vector.load %arg7[%c0_6, %c0_7] : memref<8x4xf32, #tpu.memory_space<vmem>>, vector<8x4xf32>
    %cst_8 = arith.constant dense<0.000000e+00> : vector<1x4xf32>
    %5 = tpu.matmul %2, %4, %cst_8 {dimension_numbers = #tpu.dot_dimension_numbers<[1], [0], [0], [1], [0, 0, 1, 1], [], []>} : vector<1x8xf32>, vector<8x4xf32>, vector<1x4xf32> -> vector<1x4xf32>
    %cst_9 = arith.constant 3.906250e-03 : f32
    %6 = vector.broadcast %cst_9 : f32 to vector<1x4xf32>
    %7 = arith.mulf %5, %6 : vector<1x4xf32>
    %c0_10 = arith.constant 0 : index
    %c0_11 = arith.constant 0 : index
    %8 = vector.load %arg7[%c0_10, %c0_11] : memref<8x4xf32, #tpu.memory_space<vmem>>, vector<8x4xf32>
    %cst_12 = arith.constant dense<0.000000e+00> : vector<1x4xf32>
    %9 = tpu.matmul %3, %8, %cst_12 {dimension_numbers = #tpu.dot_dimension_numbers<[1], [0], [0], [1], [0, 0, 1, 1], [], []>} : vector<1x8xf32>, vector<8x4xf32>, vector<1x4xf32> -> vector<1x4xf32>
    %cst_13 = arith.constant 3.906250e-03 : f32
    %10 = vector.broadcast %cst_13 : f32 to vector<1x4xf32>
    %11 = arith.mulf %9, %10 : vector<1x4xf32>
    %c0_14 = arith.constant 0 : index
    %c0_15 = arith.constant 0 : index
    %12 = vector.load %arg3[%c0_14, %c0_15] : memref<4x4xf32, #tpu.memory_space<vmem>>, vector<4x4xf32>
    %cst_16 = arith.constant dense<0.000000e+00> : vector<1x4xf32>
    %13 = tpu.matmul %7, %12, %cst_16 {dimension_numbers = #tpu.dot_dimension_numbers<[1], [0], [0], [1], [0, 0, 1, 1], [], []>} : vector<1x4xf32>, vector<4x4xf32>, vector<1x4xf32> -> vector<1x4xf32>
    %c0_17 = arith.constant 0 : index
    %c0_18 = arith.constant 0 : index
    %14 = vector.load %arg4[%c0_17, %c0_18] : memref<1x4xf32, #tpu.memory_space<vmem>>, vector<1x4xf32>
    %15 = arith.addf %13, %14 : vector<1x4xf32>
    %c0_19 = arith.constant 0 : index
    %c0_20 = arith.constant 0 : index
    %16 = vector.load %arg5[%c0_19, %c0_20] : memref<4x4xf32, #tpu.memory_space<vmem>>, vector<4x4xf32>
    %cst_21 = arith.constant dense<0.000000e+00> : vector<1x4xf32>
    %17 = tpu.matmul %11, %16, %cst_21 {dimension_numbers = #tpu.dot_dimension_numbers<[1], [0], [0], [1], [0, 0, 1, 1], [], []>} : vector<1x4xf32>, vector<4x4xf32>, vector<1x4xf32> -> vector<1x4xf32>
    %18 = arith.addf %15, %17 : vector<1x4xf32>
    %c0_22 = arith.constant 0 : index
    %c0_23 = arith.constant 0 : index
    %19 = vector.load %arg6[%c0_22, %c0_23] : memref<1x4xf32, #tpu.memory_space<vmem>>, vector<1x4xf32>
    %20 = arith.addf %18, %19 : vector<1x4xf32>
    %21 = arith.negf %20 : vector<1x4xf32>
    %22 = math.exp %21 : vector<1x4xf32>
    %cst_24 = arith.constant 1.000000e+00 : f32
    %23 = vector.broadcast %cst_24 : f32 to vector<1x4xf32>
    %24 = arith.addf %23, %22 : vector<1x4xf32>
    %25 = arith.divf %23, %24 : vector<1x4xf32>
    %c0_25 = arith.constant 0 : index
    %c0_26 = arith.constant 0 : index
    %26 = vector.load %arg8[%c0_25, %c0_26] : memref<4x8xf32, #tpu.memory_space<vmem>>, vector<4x8xf32>
    %cst_27 = arith.constant dense<0.000000e+00> : vector<1x8xf32>
    %27 = tpu.matmul %25, %26, %cst_27 {dimension_numbers = #tpu.dot_dimension_numbers<[1], [0], [0], [1], [0, 0, 1, 1], [], []>} : vector<1x4xf32>, vector<4x8xf32>, vector<1x8xf32> -> vector<1x8xf32>
    %28 = vector.shape_cast %27 : vector<1x8xf32> to vector<1x8x1xf32>
    %29 = vector.broadcast %28 : vector<1x8x1xf32> to vector<1x8x128xf32>
    %30 = arith.mulf %0, %29 : vector<1x8x128xf32>
    %cst_28 = arith.constant 0.000000e+00 : f32
    %31 = vector.broadcast %cst_28 : f32 to vector<1x8x128xf32>
    %32 = arith.maximumf %30, %31 : vector<1x8x128xf32>
    %c0_29 = arith.constant 0 : index
    %c0_30 = arith.constant 0 : index
    %c0_31 = arith.constant 0 : index
    %33 = vector.load %arg9[%c0_29, %c0_30, %c0_31] : memref<1x8x128xf32, #tpu.memory_space<vmem>>, vector<1x8x128xf32>
    tpu.vector_store %arg9[%c0_29, %c0_30, %c0_31], %32 {strides = array<i32>} : memref<1x8x128xf32, #tpu.memory_space<vmem>>, vector<1x8x128xf32>,
    %34 = vector.broadcast %28 : vector<1x8x1xf32> to vector<1x8x128xf32>
    %35 = arith.mulf %1, %34 : vector<1x8x128xf32>
    %cst_32 = arith.constant 0.000000e+00 : f32
    %36 = vector.broadcast %cst_32 : f32 to vector<1x8x128xf32>
    %37 = arith.maximumf %35, %36 : vector<1x8x128xf32>
    %c0_33 = arith.constant 0 : index
    %c0_34 = arith.constant 0 : index
    %c0_35 = arith.constant 0 : index
    %38 = vector.load %arg10[%c0_33, %c0_34, %c0_35] : memref<1x8x128xf32, #tpu.memory_space<vmem>>, vector<1x8x128xf32>
    tpu.vector_store %arg10[%c0_33, %c0_34, %c0_35], %37 {strides = array<i32>} : memref<1x8x128xf32, #tpu.memory_space<vmem>>, vector<1x8x128xf32>,
    return
  }
  func.func @transform_0(%arg0: i32) -> (i32, i32, i32) {
    %c0_i32 = arith.constant 0 : i32
    %c0_i32_0 = arith.constant 0 : i32
    %c0_i32_1 = arith.constant 0 : i32
    return %arg0, %c0_i32, %c0_i32_0 : i32, i32, i32
  }
  func.func @transform_1(%arg0: i32) -> (i32, i32, i32) {
    %c0_i32 = arith.constant 0 : i32
    %c0_i32_0 = arith.constant 0 : i32
    %c0_i32_1 = arith.constant 0 : i32
    return %arg0, %c0_i32, %c0_i32_0 : i32, i32, i32
  }
  func.func @transform_2(%arg0: i32) -> (i32, i32) {
    %c0_i32 = arith.constant 0 : i32
    %c0_i32_0 = arith.constant 0 : i32
    %c0_i32_1 = arith.constant 0 : i32
    return %c0_i32, %c0_i32_0 : i32, i32
  }
  func.func @transform_3(%arg0: i32) -> (i32, i32) {
    %c0_i32 = arith.constant 0 : i32
    %c0_i32_0 = arith.constant 0 : i32
    %c0_i32_1 = arith.constant 0 : i32
    return %c0_i32, %c0_i32_0 : i32, i32
  }
  func.func @transform_4(%arg0: i32) -> (i32, i32) {
    %c0_i32 = arith.constant 0 : i32
    %c0_i32_0 = arith.constant 0 : i32
    %c0_i32_1 = arith.constant 0 : i32
    return %c0_i32, %c0_i32_0 : i32, i32
  }
  func.func @transform_5(%arg0: i32) -> (i32, i32) {
    %c0_i32 = arith.constant 0 : i32
    %c0_i32_0 = arith.constant 0 : i32
    %c0_i32_1 = arith.constant 0 : i32
    return %c0_i32, %c0_i32_0 : i32, i32
  }
  func.func @transform_6(%arg0: i32) -> (i32, i32) {
    %c0_i32 = arith.constant 0 : i32
    %c0_i32_0 = arith.constant 0 : i32
    %c0_i32_1 = arith.constant 0 : i32
    return %c0_i32, %c0_i32_0 : i32, i32
  }
  func.func @transform_7(%arg0: i32) -> (i32, i32) {
    %c0_i32 = arith.constant 0 : i32
    %c0_i32_0 = arith.constant 0 : i32
    %c0_i32_1 = arith.constant 0 : i32
    return %c0_i32, %c0_i32_0 : i32, i32
  }
  func.func @transform_8(%arg0: i32) -> (i32, i32, i32) {
    %c0_i32 = arith.constant 0 : i32
    %c0_i32_0 = arith.constant 0 : i32
    %c0_i32_1 = arith.constant 0 : i32
    return %arg0, %c0_i32, %c0_i32_0 : i32, i32, i32
  }
  func.func @transform_9(%arg0: i32) -> (i32, i32, i32) {
    %c0_i32 = arith.constant 0 : i32
    %c0_i32_0 = arith.constant 0 : i32
    %c0_i32_1 = arith.constant 0 : i32
    return %arg0, %c0_i32, %c0_i32_0 : i32, i32, i32
  }
}

</mosaic_0001>

<bundles_post_ra>
// kernel: ca_forward.1
= control target key start
LH: loop header
LB: loop body
LE: loop exit
PB: predicated region body
PF: predicated region fallthrough
CT: control target
= control target key end

     0   :  { %s1003_s30 = smov 0   ;;  %s1069_s0 = inlined_call_operand.vmem [shape: f32[2,8,128], index: 0, kind: input, shape index: {}]   ;;  %s1070_s1 = inlined_call_operand.vmem [shape: f32[2,8,128], index: 1, kind: input, shape index: {}]   ;;  %s1071_s2 = inlined_call_operand.vmem [shape: f32[4,4], index: 2, kind: input, shape index: {}]   ;;  %s1072_s3 = inlined_call_operand.vmem [shape: f32[1,4], index: 3, kind: input, shape index: {}]   ;;  %s1073_s4 = inlined_call_operand.vmem [shape: f32[4,4], index: 4, kind: input, shape index: {}]   ;;  %s1074_s5 = inlined_call_operand.vmem [shape: f32[1,4], index: 5, kind: input, shape index: {}]   ;;  %s1075_s6 = inlined_call_operand.vmem [shape: f32[8,4], index: 6, kind: input, shape index: {}]   ;;  %s1076_s7 = inlined_call_operand.vmem [shape: f32[4,8], index: 7, kind: input, shape index: {}]   ;;  %s1077_s8 = inlined_call_operand.vmem [shape: f32[2,8,128], index: 8, kind: output, shape index: {0}]   ;;  %s1078_s9 = inlined_call_operand.vmem [shape: f32[2,8,128], index: 9, kind: output, shape index: {1}]  }
   0x1 LB: > { %s874_s10 = sadd.s32 4294967295, %s949_s30   ;;  %p878_p0 = scmp.ge.s32.totalorder %s949_s30, 1  ;;  %s949_s30 = sphi %s1003_s30, %s20_s30  }
   0x2   : > { %p298_p1 = scmp.lt.s32.totalorder %s949_s30, 3 }
   0x4   : > { %p299_p2 = pnand %p878_p0, %p298_p1 }
   0x5   : > { %p340_p3 = scmp.lt.s32.totalorder (!%p299_p2), %s874_s10, 1  ;;  %v951_v2 = vmov (!%p299_p2), 0.0   ;;  %v362_v3 = vld [vmem:[%s1075_s6] sm:$0xff] (!%p299_p2)  ;;  %vm952_vm0 = vmmov (!%p299_p2), 0   ;;  %v364_v4 = vlaneseq (!%p299_p2)  ;;  %vm370_vm1 = vcmask (!%p299_p2), 64512  }
   0x6   : > { %302 = sbr.rel (%p299_p2) target bundleno = 955 (0x3bb), region = 52  ;;  %904 = vmatprep.subr.mxu0 (!%p299_p2), %v951_v2  ;;  %909 = vmatprep.subr.mxu1 (!%p299_p2), %v951_v2  ;;  %v522_v12 = vld [vmem:[%s1071_s2] sm:$0xf] (!%p299_p2)  ;;  %vm528_vm2 = vcmask (!%p299_p2), 1043456   ;;  %vm524_vm3 = vcmask (!%p299_p2), 31744  }
   0x7   : > { %905 = vmatpush3.msra.mxu0 (!%p299_p2), %v362_v3  ;;  %906 = vmatprep.mubr.msk.f32.mxu0 (!%p299_p2), %vm952_vm0, %v951_v2  ;;  %v365_v5 = vand.u32 (!%p299_p2), 127, %v364_v4  ;;  %v367_v6 = vshrl.u32 (!%p299_p2), %v364_v4, 7  ;;  %v602_v13 = vld [vmem:[%s1073_s4] sm:$0xf] (!%p299_p2) }
   0x8   : > { %910 = vmatpush3.msra.mxu1 (!%p299_p2), %v362_v3  ;;  %911 = vmatprep.mubr.msk.f32.mxu1 (!%p299_p2), %vm952_vm0, %v951_v2  ;;  %v688_v20 = vld [vmem:[%s1076_s7] sm:$0xf] (!%p299_p2) }
   0x9   : > { %914 = vmatprep.subr.mxu0 (!%p299_p2), %v951_v2  ;;  %919 = vmatprep.subr.mxu1 (!%p299_p2), %v951_v2  ;;  %v368_v7 = vsub.s32 (!%p299_p2), %v365_v5, %v367_v6  ;;  %v523_v21 = vld [vmem:[%s1072_s3] sm:$0x1] (!%p299_p2)  ;;  %v767_v34 = vsub.s32 (!%p299_p2), 0, %v367_v6 }
   0xa   : > { %v680_v26 = vld [vmem:[%s1074_s5] sm:$0x1] (!%p299_p2) }
   0xd   : > { %s1080_s10 = smov (!%p340_p3, %s874_s10), 1 }
   0xe   : > { %s1011_s11 = sshll.u32 %s1080_s10, 3 }
   0xf   : > { %s343_s14 = scalar_lea.vmem %s1069_s0, %s1011_s11  ;;  %s347_s17 = scalar_lea.vmem %s1070_s1, %s1011_s11 }
  0x10   : > { %v1021_v0 = vld [vmem:[%s343_s14] sm:$0xff]  ;;  %s351_s13 = scalar_lea.vmem %s1077_s8, %s1011_s11  ;;  %s355_s16 = scalar_lea.vmem %s1078_s9, %s1011_s11 }
  0x11   : > { %358 = vadd.xlane.f32.xlu0 %v1021_v0  ;;  %v1024_v1 = vld [vmem:[%s347_s17] sm:$0xff] }
  0x15   : > { %360 = vadd.xlane.f32.xlu0 %v1024_v1 }
  0x9e   : > { %v359_v8 = vpop.xlane.xlu0 %358 }
  0x9f   : > { %v369_v9 = vrot.slane %v359_v8, %v368_v7 }
  0xa1   : > { %907 = vmatmul.mubr.msk.f32.vlgmr.msra.gmra.mrb[0].mxu0 %vm370_vm1, %v369_v9 }
  0xa2   : > { %v361_v10 = vpop.xlane.xlu0 %360  ;;  %916 = vmatprep.mubr.msk.f32.mxu0 %vm952_vm0, %v951_v2  ;;  %915 = vmatpush3.msk.msra.mxu0 %vm528_vm2, %v522_v12 }
  0xa3   : > { %v448_v11 = vrot.slane %v361_v10, %v368_v7  ;;  %924 = vmatprep.subr.mxu0 %v951_v2 }
  0xa5   : > { %912 = vmatmul.mubr.msk.f32.vlgmr.msra.gmra.mrb[0].mxu1 %vm370_vm1, %v448_v11 }
  0xa6   : > { %921 = vmatprep.mubr.msk.f32.mxu1 %vm952_vm0, %v951_v2  ;;  %920 = vmatpush3.msk.msra.mxu1 %vm528_vm2, %v602_v13 }
 0x174   : > { %v439_v14 = vpop.f32.mrb[0].mxu0 }
 0x175   : > { %v443_v15 = vmul.f32 0.00390625, %v439_v14  ;;  %v908_v16 = vpop.f32.mrb[1].mxu0 }
 0x177   : > { %917 = vmatmul.mubr.msk.f32.vlgmr.msra.gmra.mrb[2].mxu0 %vm524_vm3, %v443_v15 }
 0x178   : > { %v517_v17 = vpop.f32.mrb[0].mxu1  ;;  %926 = vmatprep.mubr.msk.f32.mxu0 %vm952_vm0, %v951_v2  ;;  %925 = vmatpush3.msk.msra.mxu0 %vm528_vm2, %v688_v20 }
 0x179   : > { %v521_v18 = vmul.f32 0.00390625, %v517_v17  ;;  %v913_v19 = vpop.f32.mrb[1].mxu1 }
 0x17b   : > { %922 = vmatmul.mubr.msk.f32.vlgmr.msra.gmra.mrb[2].mxu1 %vm524_vm3, %v521_v18 }
 0x24a   : > { %v598_v22 = vpop.f32.mrb[2].mxu0 }
 0x24b   : > { %v918_v23 = vpop.f32.mrb[3].mxu0  ;;  %v599_v24 = vadd.f32 %v598_v22, %v523_v21 }
 0x24e   : > { %v675_v25 = vpop.f32.mrb[2].mxu1 }
 0x24f   : > { %v679_v27 = vadd.f32 %v675_v25, %v599_v24  ;;  %v923_v28 = vpop.f32.mrb[3].mxu1 }
 0x251   : > { %v681_v29 = vadd.f32 %v680_v26, %v679_v27 }
 0x253   : > { %v889_v30 = vmul.f32 -1.442695, %v681_v29 }
 0x255   : > { %939 = vpow2.f32 %v889_v30 }
 0x25f   : > { %v940_v31 = vpop.eup %939 }
 0x260   : > { %v685_v32 = vadd.f32 1.0, %v940_v31 }
 0x262   : > { %941 = vrcp.f32 %v685_v32 }
 0x26c   : > { %v942_v33 = vpop.eup %941 }
 0x26d   : > { %927 = vmatmul.mubr.msk.f32.vlgmr.msra.gmra.mrb[4].mxu0 %vm524_vm3, %v942_v33 }
 0x340   : > { %v761_v35 = vpop.f32.mrb[4].mxu0 }
 0x341   : > { %v928_v36 = vpop.f32.mrb[5].mxu0  ;;  %v768_v37 = vrot.slane %v761_v35, %v767_v34 }
 0x343   : > { %770 = vbcast.lane.b32.xlu1 %v768_v37, 256 }
 0x3b5   : > { %v771_v38 = vpop.permute.xlu1 %770 }
 0x3b6   : > { %v772_v39 = vmul.f32 %v771_v38, %v1021_v0  ;;  %v775_v40 = vmul.f32 %v771_v38, %v1024_v1 }
 0x3b8   : > { %v773_v41 = vmax.f32 %v772_v39, 0.0  ;;  %v776_v42 = vmax.f32 %v775_v40, 0.0 }
 0x3ba   : > { %774 = vst [vmem:[%s351_s13] sm:$0xff] %v773_v41  ;;  %777 = vst [vmem:[%s355_s16] sm:$0xff] %v776_v42 }
 0x3bb PF: > { %s20_s30 = sadd.s32 1, %s949_s30  }
 0x3bc   : > { %p17_p4 = scmp.ge.s32.totalorder %s20_s30, 4  }
 0x3be   :  { %19 = sbr.rel (!%p17_p4) target bundleno = 1 (0x1), region = 97 }

</bundles_post_ra>
